<compile_context>
chip_gen: v5e
topology: v5e:2x2
jax: 0.10.0
libtpu: 0.0.40
codegen_flags: <defaults>
</compile_context>

<pallas_src>
import functools

import jax
import jax.numpy as jnp
from jax.experimental import pallas as pl
from jax.experimental.pallas import tpu as pltpu


# --------------------------------------------------------------------------
# Pallas kernel: neg = q @ queue.T streamed over the bank, + streaming stats
# --------------------------------------------------------------------------
def _neg_kernel(q_ref, queue_ref,                  # inputs
                neg_ref, stats_ref,                # outputs
                sum_ref, sumsq_ref, expsum_ref,    # lane-parallel VMEM scratch
                *, inv_T, with_score, fold_chunks):
    kk = pl.program_id(1)                          # position along the K stream

    if with_score:
        @pl.when(kk == 0)
        def _init():
            sum_ref[...] = jnp.zeros_like(sum_ref)
            sumsq_ref[...] = jnp.zeros_like(sumsq_ref)
            expsum_ref[...] = jnp.zeros_like(expsum_ref)
    else:
        @pl.when(kk == 0)
        def _zero_stats():                          # unused output; keep defined
            stats_ref[...] = jnp.zeros_like(stats_ref)

    q = q_ref[...]                                  # (nq, n_dim) bf16, resident
    queue_blk = queue_ref[...].astype(jnp.bfloat16)  # (tk, n_dim) streamed tile

    # neg tile = q @ queue_tile.T  (MXU, bf16 inputs, f32 accumulation)
    neg = jax.lax.dot_general(q, queue_blk,
                              (((1,), (1,)), ((), ())),
                              preferred_element_type=jnp.float32)   # (nq, tk)
    neg_scaled = neg * inv_T                # scale once; reused for store + exp
    neg_ref[...] = neg_scaled.astype(neg_ref.dtype)  # lane-dense aligned store

    if with_score:
        sq = neg * neg                      # VPU
        e = jnp.exp(neg_scaled)             # EUP

        s_acc = sum_ref[...]
        ss_acc = sumsq_ref[...]
        es_acc = expsum_ref[...]
        if fold_chunks > 0:
            # Lane-parallel accumulation: plain vreg adds (VPU only); the three
            # cross-lane reductions happen once at finalize instead of per step.
            for c in range(fold_chunks):
                lo = c * 128
                s_acc = s_acc + neg[:, lo:lo + 128]
                ss_acc = ss_acc + sq[:, lo:lo + 128]
                es_acc = es_acc + e[:, lo:lo + 128]
        else:
            # Ragged-tile fallback (tk not a multiple of 128): broadcast-add the
            # scalar row sums; only lane 0 is read at finalize.
            s_acc = s_acc + jnp.sum(neg, axis=1, keepdims=True)
            ss_acc = ss_acc + jnp.sum(sq, axis=1, keepdims=True)
            es_acc = es_acc + jnp.sum(e, axis=1, keepdims=True)
        sum_ref[...] = s_acc
        sumsq_ref[...] = ss_acc
        expsum_ref[...] = es_acc

        @pl.when(kk == pl.num_programs(1) - 1)
        def _finalize():
            if fold_chunks > 0:
                s_tot = jnp.sum(s_acc, axis=1, keepdims=True)
                ss_tot = jnp.sum(ss_acc, axis=1, keepdims=True)
                es_tot = jnp.sum(es_acc, axis=1, keepdims=True)
            else:
                s_tot = s_acc[:, 0:1]
                ss_tot = ss_acc[:, 0:1]
                es_tot = es_acc[:, 0:1]
            z = jnp.zeros_like(s_tot)
            # per-core partial statistics; reduced over cores in the wrapper
            stats_ref[...] = jnp.concatenate(
                [s_tot, ss_tot, es_tot, z, z, z, z, z], axis=1)   # (nq, 8)


# --------------------------------------------------------------------------
# Wrapper helpers
# --------------------------------------------------------------------------
def _detect_num_cores():
    """2 TensorCores per chip on v7x; 1 on v5e/v6e."""
    try:
        kind = jax.devices()[0].device_kind.lower()
    except Exception:
        return 1
    return 2 if ("v7" in kind or "tpu7" in kind) else 1


def _pick_tiling(K, n_dim, nq, block_k, num_cores, queue_itemsize, out_itemsize):
    """Largest queue tile that divides K, is a vreg-lane multiple, and keeps the
    double-buffered working set well inside VMEM (also on v7x's 64 MiB)."""
    vmem_budget = 24 << 20
    cap = min(block_k, K)
    cap -= cap % 128
    tk = 0
    t = cap
    while t >= 128:
        working = 2 * t * n_dim * queue_itemsize + 2 * nq * t * out_itemsize
        if K % t == 0 and working <= vmem_budget:
            tk = t
            break
        t -= 128
    if tk == 0:
        # TODO(synk): ragged last tile; for now fall back to one whole-queue block.
        tk = K
    steps = K // tk
    nc = num_cores if (num_cores is not None and num_cores > 1
                       and steps % num_cores == 0) else 1
    return tk, nc, steps // nc


def _queue_neg_pallas(q, queue, *, inv_T, block_k, num_cores, with_score,
                      out_dtype):
    """neg = (q @ queue.T) / T streamed over the bank + per-core partial stats."""
    nq, n_dim = q.shape
    K, n_dim_q = queue.shape
    assert n_dim == n_dim_q, "query / bank feature dims must match"
    if num_cores is None:
        num_cores = _detect_num_cores()

    out_itemsize = jnp.dtype(out_dtype).itemsize
    tk, nc, steps_per_core = _pick_tiling(K, n_dim, nq, block_k, num_cores,
                                          queue.dtype.itemsize, out_itemsize)
    fold_chunks = tk // 128 if tk % 128 == 0 else 0

    q_bf = q.astype(jnp.bfloat16)            # hoisted cast (no per-step cast)

    kernel = functools.partial(_neg_kernel, inv_T=inv_T, with_score=with_score,
                               fold_chunks=fold_chunks)

    # VMEM actually needed (double-buffered queue tile + neg tile + residents);
    # request it with headroom instead of hard-coding v7x's full 64 MiB.
    vmem_est = (2 * tk * n_dim * queue.dtype.itemsize
                + 2 * nq * n_dim * 2
                + 2 * nq * tk * out_itemsize
                + 2 * nc * nq * 8 * 4
                + 3 * nq * 128 * 4)
    vmem_limit = int(min(max(2 * vmem_est + (8 << 20), 32 << 20), 48 << 20))

    neg, stats = pl.pallas_call(
        kernel,
        grid_spec=pltpu.PrefetchScalarGridSpec(
            num_scalar_prefetch=0,
            grid=(nc, steps_per_core),
            in_specs=[
                pl.BlockSpec((nq, n_dim), lambda c, kk: (0, 0)),      # q resident
                pl.BlockSpec((tk, n_dim),
                             lambda c, kk: (c * steps_per_core + kk, 0)),  # queue
            ],
            out_specs=[
                pl.BlockSpec((nq, tk),
                             lambda c, kk: (0, c * steps_per_core + kk)),  # neg/T
                pl.BlockSpec((None, nq, 8), lambda c, kk: (c, 0, 0)),  # stats/core
            ],
            scratch_shapes=[
                pltpu.VMEM((nq, 128), jnp.float32),   # lane-parallel sum(neg)
                pltpu.VMEM((nq, 128), jnp.float32),   # lane-parallel sum(neg^2)
                pltpu.VMEM((nq, 128), jnp.float32),   # lane-parallel sum(exp)
            ],
        ),
        out_shape=(
            jax.ShapeDtypeStruct((nq, K), out_dtype),
            jax.ShapeDtypeStruct((nc, nq, 8), jnp.float32),
        ),
        compiler_params=pltpu.CompilerParams(
            dimension_semantics=("parallel", "arbitrary"),
            vmem_limit_bytes=vmem_limit,
        ),
        cost_estimate=pl.CostEstimate(
            flops=2 * nq * K * n_dim,
            transcendentals=(nq * K if with_score else 0),
            bytes_accessed=(K * n_dim * queue.dtype.itemsize
                            + nq * n_dim * 2
                            + nq * K * out_itemsize
                            + nc * nq * 8 * 4),
        ),
    )(q_bf, queue)
    return neg, stats


def _finalize_logit(q, k, neg_scaled, stats_partial, *, T, with_score,
                    concat_logits):
    """pos, logits and the 5-column score from the kernel's partial stats."""
    inv_T = 1.0 / T
    K = neg_scaled.shape[1]
    # pos = bmm(q.view(b,1,-1), k.view(b,-1,1)) == rowwise dot, kept in f32
    pos = jnp.sum(q * k, axis=1, keepdims=True)               # (bsz, 1)
    pos_scaled = pos * inv_T

    if concat_logits:
        logits = jnp.concatenate(
            [pos_scaled, neg_scaled.astype(pos_scaled.dtype)], axis=1)
    else:
        logits = (pos_scaled, neg_scaled)   # let the loss fuse the concat

    if not with_score:
        return logits, None

    tot = jnp.sum(stats_partial, axis=0)                      # reduce over cores
    s, ss, es = tot[:, 0:1], tot[:, 1:2], tot[:, 2:3]
    kf = float(K)
    mean = s / kf
    var = (ss - kf * mean * mean) / (kf - 1.0)   # unbiased var, streaming form
    exp_neg_mean = es / kf
    exp_pos_mean = jnp.exp(pos_scaled)

    def _half(x):  # reproduce the .half() rounding from the torch code
        return x.astype(jnp.float16).astype(jnp.float32)

    # TODO(synk): torch moves score to host numpy; we keep it on device.
    score = jnp.concatenate(
        [_half(mean), _half(var), _half(pos), exp_neg_mean, exp_pos_mean],
        axis=1)                                               # (bsz, 5)
    return logits, score


# --------------------------------------------------------------------------
# Functional CMCMoCo.forward
# --------------------------------------------------------------------------
def cmc_moco_forward(q1, k1, q2, k2, memory_1, memory_2, index,
                     q1_jig=None, q2_jig=None, all_k1=None, all_k2=None,
                     *, T=0.07, block_k=4096, num_cores=None,
                     with_score=True, concat_logits=True,
                     neg_dtype=jnp.float32):
    """Functional CMCMoCo.forward.

    Returns ((logits1, score1), (logits2, score2), [(l1_jig, s1_jig),
             (l2_jig, s2_jig),] labels, new_memory_1, new_memory_2, new_index).
    labels are int32 (torch uses int64).  Donate memory_1/memory_2 in the
    jitted caller so the queue update is in-place.
    """
    bsz = q1.shape[0]
    K = memory_1.shape[0]
    inv_T = 1.0 / T
    has_jig = (q1_jig is not None) and (q2_jig is not None)

    kw = dict(inv_T=inv_T, block_k=block_k, num_cores=num_cores,
              with_score=with_score, out_dtype=neg_dtype)
    fin = functools.partial(_finalize_logit, T=T, with_score=with_score,
                            concat_logits=concat_logits)

    if has_jig:
        # Fuse q with q_jig: each memory bank is streamed from HBM once instead
        # of twice, and MXU row occupancy doubles.
        neg_a, st_a = _queue_neg_pallas(
            jnp.concatenate([q1, q1_jig], axis=0), memory_2, **kw)
        neg_b, st_b = _queue_neg_pallas(
            jnp.concatenate([q2, q2_jig], axis=0), memory_1, **kw)
        out1 = fin(q1, k2, neg_a[:bsz], st_a[:, :bsz])
        out1_jig = fin(q1_jig, k2, neg_a[bsz:], st_a[:, bsz:])
        out2 = fin(q2, k1, neg_b[:bsz], st_b[:, :bsz])
        out2_jig = fin(q2_jig, k1, neg_b[bsz:], st_b[:, bsz:])
    else:
        neg_a, st_a = _queue_neg_pallas(q1, memory_2, **kw)
        neg_b, st_b = _queue_neg_pallas(q2, memory_1, **kw)
        out1 = fin(q1, k2, neg_a, st_a)
        out2 = fin(q2, k1, neg_b, st_b)

    labels = jnp.zeros((bsz,), dtype=jnp.int32)   # torch uses int64

    # _update_memory: queue.index_copy_(0, (arange(bsz) + index) % K, all_k)
    all_k1 = k1 if all_k1 is None else all_k1
    all_k2 = k2 if all_k2 is None else all_k2
    n_new = all_k1.shape[0]
    ids = (jnp.arange(n_new) + index) % K
    new_memory_1 = memory_1.at[ids].set(all_k1.astype(memory_1.dtype))
    new_memory_2 = memory_2.at[ids].set(all_k2.astype(memory_2.dtype))
    new_index = (index + n_new) % K

    if has_jig:
        return (out1, out2, out1_jig, out2_jig, labels,
                new_memory_1, new_memory_2, new_index)
    return (out1, out2, labels, new_memory_1, new_memory_2, new_index)


# --------------------------------------------------------------------------
# Demo / self-test
# --------------------------------------------------------------------------
if __name__ == "__main__":
    bsz, n_dim, K, T = 8, 128, 512, 0.07
    block_k = 128   # small so the test exercises several pipelined grid steps

    key = jax.random.PRNGKey(0)
    km1, km2, kq1, kk1, kq2, kk2, kj1, kj2 = jax.random.split(key, 8)

    def _unit_rows(k, shape):
        x = jax.random.normal(k, shape, jnp.float32)
        return x / jnp.linalg.norm(x, axis=1, keepdims=True)

    # register_buffer('memory_i', randn(K, n_dim)); F.normalize(...)
    # Bank stored in bf16 in HBM (halves the dominant streaming traffic).
    memory_1 = _unit_rows(km1, (K, n_dim)).astype(jnp.bfloat16)
    memory_2 = _unit_rows(km2, (K, n_dim)).astype(jnp.bfloat16)

    q1 = _unit_rows(kq1, (bsz, n_dim)); k1 = _unit_rows(kk1, (bsz, n_dim))
    q2 = _unit_rows(kq2, (bsz, n_dim)); k2 = _unit_rows(kk2, (bsz, n_dim))
    q1_jig = _unit_rows(kj1, (bsz, n_dim)); q2_jig = _unit_rows(kj2, (bsz, n_dim))

    # ---- pure-JAX reference (same bf16 queue / bf16 matmul inputs) ----
    def ref_compute(q, k, queue):
        pos = jnp.sum(q * k, axis=1, keepdims=True)
        neg = jax.lax.dot_general(q.astype(jnp.bfloat16),
                                  queue.astype(jnp.bfloat16),
                                  (((1,), (1,)), ((), ())),
                                  preferred_element_type=jnp.float32)
        logits = jnp.concatenate([pos, neg], axis=1) / T
        mean = jnp.mean(neg, axis=1, keepdims=True)
        var = jnp.sum((neg - mean) ** 2, axis=1, keepdims=True) / (neg.shape[1] - 1)
        half = lambda x: x.astype(jnp.float16).astype(jnp.float32)
        score = jnp.concatenate(
            [half(mean), half(var), half(pos),
             jnp.mean(jnp.exp(neg / T), axis=1, keepdims=True),
             jnp.exp(pos / T)], axis=1)
        return logits, score

    # references computed BEFORE the donated call consumes the memory buffers
    ref_l1, ref_s1 = ref_compute(q1, k2, memory_2)
    ref_l2, ref_s2 = ref_compute(q2, k1, memory_1)
    ref_l1j, ref_s1j = ref_compute(q1_jig, k2, memory_2)
    ref_l2j, ref_s2j = ref_compute(q2_jig, k1, memory_1)
    jax.block_until_ready((ref_l1, ref_l2, ref_l1j, ref_l2j))

    # donate the memory banks so the index_copy_ update is in-place
    fwd = jax.jit(functools.partial(cmc_moco_forward, T=T, block_k=block_k),
                  donate_argnums=(4, 5))
    out = fwd(q1, k1, q2, k2, memory_1, memory_2, 0, q1_jig, q2_jig)
    ((l1, s1), (l2, s2), (l1j, s1j), (l2j, s2j),
     labels, new_m1, new_m2, new_index) = out
    jax.block_until_ready((l1, l2, l1j, l2j, s1, s2, s1j, s2j,
                           labels, new_m1, new_m2))

    assert l1.shape == (bsz, 1 + K) and l2.shape == (bsz, 1 + K)
    assert l1j.shape == (bsz, 1 + K) and l2j.shape == (bsz, 1 + K)
    assert s1.shape == (bsz, 5) and s2.shape == (bsz, 5)
    assert labels.shape == (bsz,)

    assert jnp.allclose(l1, ref_l1, rtol=2e-3, atol=2e-3)
    assert jnp.allclose(l2, ref_l2, rtol=2e-3, atol=2e-3)
    assert jnp.allclose(l1j, ref_l1j, rtol=2e-3, atol=2e-3)
    assert jnp.allclose(l2j, ref_l2j, rtol=2e-3, atol=2e-3)
    assert jnp.allclose(s1, ref_s1, rtol=1e-2, atol=1e-2)
    assert jnp.allclose(s2, ref_s2, rtol=1e-2, atol=1e-2)
    assert jnp.allclose(s1j, ref_s1j, rtol=1e-2, atol=1e-2)
    assert jnp.allclose(s2j, ref_s2j, rtol=1e-2, atol=1e-2)

    # memory update: rows [0, bsz) replaced by the (unmixed) keys
    assert jnp.allclose(new_m1[:bsz].astype(jnp.float32),
                        k1.astype(jnp.bfloat16).astype(jnp.float32))
    assert jnp.allclose(new_m2[:bsz].astype(jnp.float32),
                        k2.astype(jnp.bfloat16).astype(jnp.float32))
    assert int(new_index) == bsz % K

    print("KERNEL_OK")
</pallas_src>

<mosaic_0001>
module attributes {stable_mosaic.version = 11 : i64} {
  func.func @_neg_kernel(%arg0: i32, %arg1: i32, %arg2: memref<16x128xbf16, #tpu.memory_space<vmem>>, %arg3: memref<128x128xbf16, #tpu.memory_space<vmem>>, %arg4: memref<16x128xf32, #tpu.memory_space<vmem>>, %arg5: memref<1x16x8xf32, #tpu.memory_space<vmem>>, %arg6: memref<16x128xf32, #tpu.memory_space<vmem>>, %arg7: memref<16x128xf32, #tpu.memory_space<vmem>>, %arg8: memref<16x128xf32, #tpu.memory_space<vmem>>) attributes {dimension_semantics = [#tpu.dimension_semantics<parallel>, #tpu.dimension_semantics<arbitrary>], iteration_bounds = array<i64: 1, 4>, scalar_prefetch = 0 : i64, scratch_operands = 3 : i64, tpu.core_type = #tpu.core_type<tc>, window_params = [{pipeline_mode = #tpu.pipeline_mode<synchronous>, transform_indices = @transform_0, window_bounds = array<i64: 16, 128>}, {transform_indices = @transform_1, window_bounds = array<i64: 128, 128>}, {transform_indices = @transform_2, window_bounds = array<i64: 16, 128>}, {transform_indices = @transform_3, window_bounds = array<i64: 1, 16, 8>}]} {
    %c0_i32 = arith.constant 0 : i32
    %0 = arith.cmpi eq, %arg1, %c0_i32 : i32
    %1 = arith.extui %0 : i1 to i32
    %c0_i32_0 = arith.constant 0 : i32
    %2 = arith.cmpi ne, %1, %c0_i32_0 : i32
    scf.if %2 {
      %cst_20 = arith.constant 0.000000e+00 : f32
      %23 = vector.broadcast %cst_20 : f32 to vector<16x128xf32>
      %c0_21 = arith.constant 0 : index
      %c0_22 = arith.constant 0 : index
      %24 = vector.load %arg6[%c0_21, %c0_22] : memref<16x128xf32, #tpu.memory_space<vmem>>, vector<16x128xf32>
      tpu.vector_store %arg6[%c0_21, %c0_22], %23 {strides = array<i32>} : memref<16x128xf32, #tpu.memory_space<vmem>>, vector<16x128xf32>,
      %cst_23 = arith.constant 0.000000e+00 : f32
      %25 = vector.broadcast %cst_23 : f32 to vector<16x128xf32>
      %c0_24 = arith.constant 0 : index
      %c0_25 = arith.constant 0 : index
      %26 = vector.load %arg7[%c0_24, %c0_25] : memref<16x128xf32, #tpu.memory_space<vmem>>, vector<16x128xf32>
      tpu.vector_store %arg7[%c0_24, %c0_25], %25 {strides = array<i32>} : memref<16x128xf32, #tpu.memory_space<vmem>>, vector<16x128xf32>,
      %cst_26 = arith.constant 0.000000e+00 : f32
      %27 = vector.broadcast %cst_26 : f32 to vector<16x128xf32>
      %c0_27 = arith.constant 0 : index
      %c0_28 = arith.constant 0 : index
      %28 = vector.load %arg8[%c0_27, %c0_28] : memref<16x128xf32, #tpu.memory_space<vmem>>, vector<16x128xf32>
      tpu.vector_store %arg8[%c0_27, %c0_28], %27 {strides = array<i32>} : memref<16x128xf32, #tpu.memory_space<vmem>>, vector<16x128xf32>,
    } else {
    }
    %c0 = arith.constant 0 : index
    %c0_1 = arith.constant 0 : index
    %3 = vector.load %arg2[%c0, %c0_1] : memref<16x128xbf16, #tpu.memory_space<vmem>>, vector<16x128xbf16>
    %c0_2 = arith.constant 0 : index
    %c0_3 = arith.constant 0 : index
    %4 = vector.load %arg3[%c0_2, %c0_3] : memref<128x128xbf16, #tpu.memory_space<vmem>>, vector<128x128xbf16>
    %cst = arith.constant dense<0.000000e+00> : vector<16x128xf32>
    %5 = tpu.matmul %3, %4, %cst {dimension_numbers = #tpu.dot_dimension_numbers<[1], [1], [0], [0], [0, 0, 1, 0], [], []>} : vector<16x128xbf16>, vector<128x128xbf16>, vector<16x128xf32> -> vector<16x128xf32>
    %cst_4 = arith.constant 14.2857141 : f32
    %6 = vector.broadcast %cst_4 : f32 to vector<16x128xf32>
    %7 = arith.mulf %5, %6 : vector<16x128xf32>
    %c0_5 = arith.constant 0 : index
    %c0_6 = arith.constant 0 : index
    %8 = vector.load %arg4[%c0_5, %c0_6] : memref<16x128xf32, #tpu.memory_space<vmem>>, vector<16x128xf32>
    tpu.vector_store %arg4[%c0_5, %c0_6], %7 {strides = array<i32>} : memref<16x128xf32, #tpu.memory_space<vmem>>, vector<16x128xf32>,
    %9 = arith.mulf %5, %5 : vector<16x128xf32>
    %10 = math.exp %7 : vector<16x128xf32>
    %c0_7 = arith.constant 0 : index
    %c0_8 = arith.constant 0 : index
    %11 = vector.load %arg6[%c0_7, %c0_8] : memref<16x128xf32, #tpu.memory_space<vmem>>, vector<16x128xf32>
    %c0_9 = arith.constant 0 : index
    %c0_10 = arith.constant 0 : index
    %12 = vector.load %arg7[%c0_9, %c0_10] : memref<16x128xf32, #tpu.memory_space<vmem>>, vector<16x128xf32>
    %c0_11 = arith.constant 0 : index
    %c0_12 = arith.constant 0 : index
    %13 = vector.load %arg8[%c0_11, %c0_12] : memref<16x128xf32, #tpu.memory_space<vmem>>, vector<16x128xf32>
    %14 = arith.addf %11, %5 : vector<16x128xf32>
    %15 = arith.addf %12, %9 : vector<16x128xf32>
    %16 = arith.addf %13, %10 : vector<16x128xf32>
    %c0_13 = arith.constant 0 : index
    %c0_14 = arith.constant 0 : index
    %17 = vector.load %arg6[%c0_13, %c0_14] : memref<16x128xf32, #tpu.memory_space<vmem>>, vector<16x128xf32>
    tpu.vector_store %arg6[%c0_13, %c0_14], %14 {strides = array<i32>} : memref<16x128xf32, #tpu.memory_space<vmem>>, vector<16x128xf32>,
    %c0_15 = arith.constant 0 : index
    %c0_16 = arith.constant 0 : index
    %18 = vector.load %arg7[%c0_15, %c0_16] : memref<16x128xf32, #tpu.memory_space<vmem>>, vector<16x128xf32>
    tpu.vector_store %arg7[%c0_15, %c0_16], %15 {strides = array<i32>} : memref<16x128xf32, #tpu.memory_space<vmem>>, vector<16x128xf32>,
    %c0_17 = arith.constant 0 : index
    %c0_18 = arith.constant 0 : index
    %19 = vector.load %arg8[%c0_17, %c0_18] : memref<16x128xf32, #tpu.memory_space<vmem>>, vector<16x128xf32>
    tpu.vector_store %arg8[%c0_17, %c0_18], %16 {strides = array<i32>} : memref<16x128xf32, #tpu.memory_space<vmem>>, vector<16x128xf32>,
    %c3_i32 = arith.constant 3 : i32
    %20 = arith.cmpi eq, %arg1, %c3_i32 : i32
    %21 = arith.extui %20 : i1 to i32
    %c0_i32_19 = arith.constant 0 : i32
    %22 = arith.cmpi ne, %21, %c0_i32_19 : i32
    scf.if %22 {
      %cst_20 = arith.constant dense<0.000000e+00> : vector<16xf32>
      %23 = vector.multi_reduction <add>, %14, %cst_20 [1] : vector<16x128xf32> to vector<16xf32>
      %24 = vector.shape_cast %23 : vector<16xf32> to vector<16x1xf32>
      %cst_21 = arith.constant dense<0.000000e+00> : vector<16xf32>
      %25 = vector.multi_reduction <add>, %15, %cst_21 [1] : vector<16x128xf32> to vector<16xf32>
      %26 = vector.shape_cast %25 : vector<16xf32> to vector<16x1xf32>
      %cst_22 = arith.constant dense<0.000000e+00> : vector<16xf32>
      %27 = vector.multi_reduction <add>, %16, %cst_22 [1] : vector<16x128xf32> to vector<16xf32>
      %28 = vector.shape_cast %27 : vector<16xf32> to vector<16x1xf32>
      %cst_23 = arith.constant 0.000000e+00 : f32
      %29 = vector.broadcast %cst_23 : f32 to vector<16x1xf32>
      %30 = tpu.concatenate %24, %26, %28, %29, %29, %29, %29, %29 in 1 : vector<16x1xf32>, vector<16x1xf32>, vector<16x1xf32>, vector<16x1xf32>, vector<16x1xf32>, vector<16x1xf32>, vector<16x1xf32>, vector<16x1xf32> -> vector<16x8xf32>
      %c0_24 = arith.constant 0 : index
      %c0_25 = arith.constant 0 : index
      %c0_26 = arith.constant 0 : index
      %31 = vector.load %arg5[%c0_24, %c0_25, %c0_26] : memref<1x16x8xf32, #tpu.memory_space<vmem>>, vector<1x16x8xf32>
      %32 = vector.shape_cast %31 : vector<1x16x8xf32> to vector<16x8xf32>
      %33 = vector.shape_cast %30 : vector<16x8xf32> to vector<1x16x8xf32>
      tpu.vector_store %arg5[%c0_24, %c0_25, %c0_26], %33 {strides = array<i32>} : memref<1x16x8xf32, #tpu.memory_space<vmem>>, vector<1x16x8xf32>,
    } else {
    }
    return
  }
  func.func @transform_0(%arg0: i32, %arg1: i32) -> (i32, i32) {
    %c0_i32 = arith.constant 0 : i32
    %c0_i32_0 = arith.constant 0 : i32
    %c0_i32_1 = arith.constant 0 : i32
    return %c0_i32, %c0_i32_0 : i32, i32
  }
  func.func @transform_1(%arg0: i32, %arg1: i32) -> (i32, i32) {
    %c4_i32 = arith.constant 4 : i32
    %0 = arith.muli %arg0, %c4_i32 : i32
    %1 = arith.addi %0, %arg1 : i32
    %c0_i32 = arith.constant 0 : i32
    %c0_i32_0 = arith.constant 0 : i32
    return %1, %c0_i32 : i32, i32
  }
  func.func @transform_2(%arg0: i32, %arg1: i32) -> (i32, i32) {
    %c4_i32 = arith.constant 4 : i32
    %0 = arith.muli %arg0, %c4_i32 : i32
    %1 = arith.addi %0, %arg1 : i32
    %c0_i32 = arith.constant 0 : i32
    %c0_i32_0 = arith.constant 0 : i32
    return %c0_i32, %1 : i32, i32
  }
  func.func @transform_3(%arg0: i32, %arg1: i32) -> (i32, i32, i32) {
    %c0_i32 = arith.constant 0 : i32
    %c0_i32_0 = arith.constant 0 : i32
    %c0_i32_1 = arith.constant 0 : i32
    return %arg0, %c0_i32, %c0_i32_0 : i32, i32, i32
  }
}

module attributes {stable_mosaic.version = 11 : i64} {
  func.func @_neg_kernel(%arg0: i32, %arg1: i32, %arg2: memref<16x128xbf16, #tpu.memory_space<vmem>>, %arg3: memref<128x128xbf16, #tpu.memory_space<vmem>>, %arg4: memref<16x128xf32, #tpu.memory_space<vmem>>, %arg5: memref<1x16x8xf32, #tpu.memory_space<vmem>>, %arg6: memref<16x128xf32, #tpu.memory_space<vmem>>, %arg7: memref<16x128xf32, #tpu.memory_space<vmem>>, %arg8: memref<16x128xf32, #tpu.memory_space<vmem>>) attributes {dimension_semantics = [#tpu.dimension_semantics<parallel>, #tpu.dimension_semantics<arbitrary>], iteration_bounds = array<i64: 1, 4>, scalar_prefetch = 0 : i64, scratch_operands = 3 : i64, tpu.core_type = #tpu.core_type<tc>, window_params = [{pipeline_mode = #tpu.pipeline_mode<synchronous>, transform_indices = @transform_0, window_bounds = array<i64: 16, 128>}, {transform_indices = @transform_1, window_bounds = array<i64: 128, 128>}, {transform_indices = @transform_2, window_bounds = array<i64: 16, 128>}, {transform_indices = @transform_3, window_bounds = array<i64: 1, 16, 8>}]} {
    %c0_i32 = arith.constant 0 : i32
    %0 = arith.cmpi eq, %arg1, %c0_i32 : i32
    %1 = arith.extui %0 : i1 to i32
    %c0_i32_0 = arith.constant 0 : i32
    %2 = arith.cmpi ne, %1, %c0_i32_0 : i32
    scf.if %2 {
      %cst_20 = arith.constant 0.000000e+00 : f32
      %23 = vector.broadcast %cst_20 : f32 to vector<16x128xf32>
      %c0_21 = arith.constant 0 : index
      %c0_22 = arith.constant 0 : index
      %24 = vector.load %arg6[%c0_21, %c0_22] : memref<16x128xf32, #tpu.memory_space<vmem>>, vector<16x128xf32>
      tpu.vector_store %arg6[%c0_21, %c0_22], %23 {strides = array<i32>} : memref<16x128xf32, #tpu.memory_space<vmem>>, vector<16x128xf32>,
      %cst_23 = arith.constant 0.000000e+00 : f32
      %25 = vector.broadcast %cst_23 : f32 to vector<16x128xf32>
      %c0_24 = arith.constant 0 : index
      %c0_25 = arith.constant 0 : index
      %26 = vector.load %arg7[%c0_24, %c0_25] : memref<16x128xf32, #tpu.memory_space<vmem>>, vector<16x128xf32>
      tpu.vector_store %arg7[%c0_24, %c0_25], %25 {strides = array<i32>} : memref<16x128xf32, #tpu.memory_space<vmem>>, vector<16x128xf32>,
      %cst_26 = arith.constant 0.000000e+00 : f32
      %27 = vector.broadcast %cst_26 : f32 to vector<16x128xf32>
      %c0_27 = arith.constant 0 : index
      %c0_28 = arith.constant 0 : index
      %28 = vector.load %arg8[%c0_27, %c0_28] : memref<16x128xf32, #tpu.memory_space<vmem>>, vector<16x128xf32>
      tpu.vector_store %arg8[%c0_27, %c0_28], %27 {strides = array<i32>} : memref<16x128xf32, #tpu.memory_space<vmem>>, vector<16x128xf32>,
    } else {
    }
    %c0 = arith.constant 0 : index
    %c0_1 = arith.constant 0 : index
    %3 = vector.load %arg2[%c0, %c0_1] : memref<16x128xbf16, #tpu.memory_space<vmem>>, vector<16x128xbf16>
    %c0_2 = arith.constant 0 : index
    %c0_3 = arith.constant 0 : index
    %4 = vector.load %arg3[%c0_2, %c0_3] : memref<128x128xbf16, #tpu.memory_space<vmem>>, vector<128x128xbf16>
    %cst = arith.constant dense<0.000000e+00> : vector<16x128xf32>
    %5 = tpu.matmul %3, %4, %cst {dimension_numbers = #tpu.dot_dimension_numbers<[1], [1], [0], [0], [0, 0, 1, 0], [], []>} : vector<16x128xbf16>, vector<128x128xbf16>, vector<16x128xf32> -> vector<16x128xf32>
    %cst_4 = arith.constant 14.2857141 : f32
    %6 = vector.broadcast %cst_4 : f32 to vector<16x128xf32>
    %7 = arith.mulf %5, %6 : vector<16x128xf32>
    %c0_5 = arith.constant 0 : index
    %c0_6 = arith.constant 0 : index
    %8 = vector.load %arg4[%c0_5, %c0_6] : memref<16x128xf32, #tpu.memory_space<vmem>>, vector<16x128xf32>
    tpu.vector_store %arg4[%c0_5, %c0_6], %7 {strides = array<i32>} : memref<16x128xf32, #tpu.memory_space<vmem>>, vector<16x128xf32>,
    %9 = arith.mulf %5, %5 : vector<16x128xf32>
    %10 = math.exp %7 : vector<16x128xf32>
    %c0_7 = arith.constant 0 : index
    %c0_8 = arith.constant 0 : index
    %11 = vector.load %arg6[%c0_7, %c0_8] : memref<16x128xf32, #tpu.memory_space<vmem>>, vector<16x128xf32>
    %c0_9 = arith.constant 0 : index
    %c0_10 = arith.constant 0 : index
    %12 = vector.load %arg7[%c0_9, %c0_10] : memref<16x128xf32, #tpu.memory_space<vmem>>, vector<16x128xf32>
    %c0_11 = arith.constant 0 : index
    %c0_12 = arith.constant 0 : index
    %13 = vector.load %arg8[%c0_11, %c0_12] : memref<16x128xf32, #tpu.memory_space<vmem>>, vector<16x128xf32>
    %14 = arith.addf %11, %5 : vector<16x128xf32>
    %15 = arith.addf %12, %9 : vector<16x128xf32>
    %16 = arith.addf %13, %10 : vector<16x128xf32>
    %c0_13 = arith.constant 0 : index
    %c0_14 = arith.constant 0 : index
    %17 = vector.load %arg6[%c0_13, %c0_14] : memref<16x128xf32, #tpu.memory_space<vmem>>, vector<16x128xf32>
    tpu.vector_store %arg6[%c0_13, %c0_14], %14 {strides = array<i32>} : memref<16x128xf32, #tpu.memory_space<vmem>>, vector<16x128xf32>,
    %c0_15 = arith.constant 0 : index
    %c0_16 = arith.constant 0 : index
    %18 = vector.load %arg7[%c0_15, %c0_16] : memref<16x128xf32, #tpu.memory_space<vmem>>, vector<16x128xf32>
    tpu.vector_store %arg7[%c0_15, %c0_16], %15 {strides = array<i32>} : memref<16x128xf32, #tpu.memory_space<vmem>>, vector<16x128xf32>,
    %c0_17 = arith.constant 0 : index
    %c0_18 = arith.constant 0 : index
    %19 = vector.load %arg8[%c0_17, %c0_18] : memref<16x128xf32, #tpu.memory_space<vmem>>, vector<16x128xf32>
    tpu.vector_store %arg8[%c0_17, %c0_18], %16 {strides = array<i32>} : memref<16x128xf32, #tpu.memory_space<vmem>>, vector<16x128xf32>,
    %c3_i32 = arith.constant 3 : i32
    %20 = arith.cmpi eq, %arg1, %c3_i32 : i32
    %21 = arith.extui %20 : i1 to i32
    %c0_i32_19 = arith.constant 0 : i32
    %22 = arith.cmpi ne, %21, %c0_i32_19 : i32
    scf.if %22 {
      %cst_20 = arith.constant dense<0.000000e+00> : vector<16xf32>
      %23 = vector.multi_reduction <add>, %14, %cst_20 [1] : vector<16x128xf32> to vector<16xf32>
      %24 = vector.shape_cast %23 : vector<16xf32> to vector<16x1xf32>
      %cst_21 = arith.constant dense<0.000000e+00> : vector<16xf32>
      %25 = vector.multi_reduction <add>, %15, %cst_21 [1] : vector<16x128xf32> to vector<16xf32>
      %26 = vector.shape_cast %25 : vector<16xf32> to vector<16x1xf32>
      %cst_22 = arith.constant dense<0.000000e+00> : vector<16xf32>
      %27 = vector.multi_reduction <add>, %16, %cst_22 [1] : vector<16x128xf32> to vector<16xf32>
      %28 = vector.shape_cast %27 : vector<16xf32> to vector<16x1xf32>
      %cst_23 = arith.constant 0.000000e+00 : f32
      %29 = vector.broadcast %cst_23 : f32 to vector<16x1xf32>
      %30 = tpu.concatenate %24, %26, %28, %29, %29, %29, %29, %29 in 1 : vector<16x1xf32>, vector<16x1xf32>, vector<16x1xf32>, vector<16x1xf32>, vector<16x1xf32>, vector<16x1xf32>, vector<16x1xf32>, vector<16x1xf32> -> vector<16x8xf32>
      %c0_24 = arith.constant 0 : index
      %c0_25 = arith.constant 0 : index
      %c0_26 = arith.constant 0 : index
      %31 = vector.load %arg5[%c0_24, %c0_25, %c0_26] : memref<1x16x8xf32, #tpu.memory_space<vmem>>, vector<1x16x8xf32>
      %32 = vector.shape_cast %31 : vector<1x16x8xf32> to vector<16x8xf32>
      %33 = vector.shape_cast %30 : vector<16x8xf32> to vector<1x16x8xf32>
      tpu.vector_store %arg5[%c0_24, %c0_25, %c0_26], %33 {strides = array<i32>} : memref<1x16x8xf32, #tpu.memory_space<vmem>>, vector<1x16x8xf32>,
    } else {
    }
    return
  }
  func.func @transform_0(%arg0: i32, %arg1: i32) -> (i32, i32) {
    %c0_i32 = arith.constant 0 : i32
    %c0_i32_0 = arith.constant 0 : i32
    %c0_i32_1 = arith.constant 0 : i32
    return %c0_i32, %c0_i32_0 : i32, i32
  }
  func.func @transform_1(%arg0: i32, %arg1: i32) -> (i32, i32) {
    %c4_i32 = arith.constant 4 : i32
    %0 = arith.muli %arg0, %c4_i32 : i32
    %1 = arith.addi %0, %arg1 : i32
    %c0_i32 = arith.constant 0 : i32
    %c0_i32_0 = arith.constant 0 : i32
    return %1, %c0_i32 : i32, i32
  }
  func.func @transform_2(%arg0: i32, %arg1: i32) -> (i32, i32) {
    %c4_i32 = arith.constant 4 : i32
    %0 = arith.muli %arg0, %c4_i32 : i32
    %1 = arith.addi %0, %arg1 : i32
    %c0_i32 = arith.constant 0 : i32
    %c0_i32_0 = arith.constant 0 : i32
    return %c0_i32, %1 : i32, i32
  }
  func.func @transform_3(%arg0: i32, %arg1: i32) -> (i32, i32, i32) {
    %c0_i32 = arith.constant 0 : i32
    %c0_i32_0 = arith.constant 0 : i32
    %c0_i32_1 = arith.constant 0 : i32
    return %arg0, %c0_i32, %c0_i32_0 : i32, i32, i32
  }
}

</mosaic_0001>

<bundles_post_ra>
// kernel: cmc_moco_forward.2
= control target key start
LH: loop header
LB: loop body
LE: loop exit
PB: predicated region body
PF: predicated region fallthrough
CT: control target
= control target key end

     0   :  { %s681_s12 = smov 0   ;;  %s683_s13 = smov 0   ;;  %s775_s0 = inlined_call_operand.vmem [shape: bf16[16,128], index: 0, kind: input, shape index: {}]   ;;  %s776_s1 = inlined_call_operand.vmem [shape: bf16[512,128], index: 1, kind: input, shape index: {}]   ;;  %s777_s2 = inlined_call_operand.vmem [shape: f32[16,512], index: 2, kind: output, shape index: {0}]   ;;  %s778_s3 = inlined_call_operand.vmem [shape: f32[1,16,8], index: 3, kind: output, shape index: {1}]  }
   0x1   :  { %s685_s14 = smov 0   ;;  %s687_s15 = smov 0  }
   0x2   :  { %s689_s16 = smov 0  }
   0x3 LB: > { %s515_s17 = sadd.s32 4294967295, %s658_s16   ;;  %s23_s18 = sadd.s32 1, %s654_s15  ;;  %s658_s16 = sphi %s689_s16, %s14_s16   ;;  %s654_s15 = sphi %s687_s15, %s783_s15   ;;  %s650_s14 = sphi %s685_s14, %s782_s14   ;;  %s646_s13 = sphi %s683_s13, %s781_s13   ;;  %s642_s12 = sphi %s681_s12, %s780_s12  }
   0x4   : > { %p24_p0 = scmp.ge.s32.totalorder %s23_s18, 4  ;;  %s88_s19 = sadd.s32 1, %s646_s13 }
   0x5   : > { %p98_p1 = scmp.ne.s32.totalorder %s646_s13, %s642_s12  ;;  %p99_p2 = scmp.eq.s32.totalorder %s515_s17, 3 }
   0x6   : > { %s785_s18 = smov (%p24_p0, %s23_s18), 0  ;;  %p519_p4 = scmp.ge.s32.totalorder %s658_s16, 1 }
   0x7   : > { %p710_p3 = por %p99_p2, %p98_p1  ;;  %s85_s21 = ssub.s32 %s654_s15, %s785_s18 }
   0x8   : > { %p165_p5 = scmp.lt.s32.totalorder %s658_s16, 5  ;;  %p86_p6 = scmp.eq.s32.totalorder %s85_s21, 0 }
   0xa   : > { %p166_p7 = pnand %p519_p4, %p165_p5 }
   0xb   : > { %s719_s22 = scalar_select %p86_p6, %s646_s13, %s88_s19  }
   0xc   : > { %169 = sbr.rel (%p166_p7) target bundleno = 378 (0x17a), region = 28  ;;  %s185_s23 = sand.u32 (!%p166_p7), 1, %s642_s12  }
   0xd   : > { %s521_s24 = sshll.u32 (!%p166_p7), %s650_s14, 4  ;;  %s520_s25 = sshll.u32 (!%p166_p7), %s185_s23, 4 }
   0xe   : > { %p198_p8 = scmp.lt.s32.totalorder (!%p166_p7), %s521_s24, 63  ;;  %s725_s30 = scalar_lea.vmem (!%p166_p7), [#allocation5], %s520_s25 }
   0xf   : > { %p523_p9 = scmp.ne.s32.totalorder (!%p166_p7), %s650_s14, 0 }
  0x11   : > { %s787_s24 = smov (!%p198_p8, %s521_s24), 63  ;;  %215 = sbr.rel (%p523_p9) target bundleno = 29 (0x1d), region = 32 }
  0x12   : > { %s522_s26 = sshll.u32 %s787_s24, 2 }
  0x13   : > { %s201_s29 = scalar_lea.vmem %s776_s1, %s522_s26 }
  0x16   : > { %v660_v0 = vmov 0.0  }
  0x17   : > { %216 = vst [vmem:[#allocation2] sm:$0xff] %v660_v0 }
  0x18   : > { %217 = vst [vmem:[#allocation2 + $0x8] sm:$0xff] %v660_v0 }
  0x19   : > { %218 = vst [vmem:[#allocation3 + $0x8] sm:$0xff] %v660_v0 }
  0x1a   : > { %219 = vst [vmem:[#allocation3] sm:$0xff] %v660_v0 }
  0x1b   : > { %220 = vst [vmem:[#allocation4 + $0x8] sm:$0xff] %v660_v0 }
  0x1c   : > { %221 = vst [vmem:[#allocation4] sm:$0xff] %v660_v0 }
  0x1d PF: > { %v574_v1 = vld [vmem:[%s201_s29 + $0x38] sm:$0xff]  ;;  %v573_v2 = vld [vmem:[%s201_s29 + $0x30] sm:$0xff]  ;;  %v572_v3 = vld [vmem:[%s201_s29 + $0x28] sm:$0xff]  ;;  %p560_p10 = scmp.ne.s32.totalorder %s650_s14, 3 }
  0x1e   : > { %294 = vmatpush.bf16.xpose.msra.mxu0 %v574_v1  ;;  %v571_v4 = vld [vmem:[%s201_s29 + $0x20] sm:$0xff]  ;;  %v570_v5 = vld [vmem:[%s201_s29 + $0x18] sm:$0xff]  ;;  %v569_v6 = vld [vmem:[%s201_s29 + $0x10] sm:$0xff] }
  0x1f   : > { %v568_v7 = vld [vmem:[%s201_s29 + $0x8] sm:$0xff]  ;;  %v567_v8 = vld [vmem:[%s201_s29] sm:$0xff] }
  0x20   : > { %v566_v9 = vld [vmem:[%s775_s0] sm:$0xff]  ;;  %v320_v12 = vld [vmem:[#allocation3 + $0x8] sm:$0xff]  ;;  %v319_v18 = vld [vmem:[#allocation2 + $0x8] sm:$0xff] }
  0x21   : > { %v318_v10 = vld [vmem:[#allocation2] sm:$0xff]  ;;  %v321_v20 = vld [vmem:[#allocation3] sm:$0xff] }
  0x22   : > { %v322_v21 = vld [vmem:[#allocation4 + $0x8] sm:$0xff] }
  0x23   : > { %v323_v29 = vld [vmem:[#allocation4] sm:$0xff] }
  0x26   : > { %295 = vmatpush.bf16.xpose.msra.mxu0 %v573_v2 }
  0x2e   : > { %296 = vmatpush.bf16.xpose.msra.mxu0 %v572_v3 }
  0x36   : > { %297 = vmatpush.bf16.xpose.msra.mxu0 %v571_v4 }
  0x3e   : > { %298 = vmatpush.bf16.xpose.msra.mxu0 %v570_v5 }
  0x46   : > { %299 = vmatpush.bf16.xpose.msra.mxu0 %v569_v6 }
  0x4e   : > { %300 = vmatpush.bf16.xpose.msra.mxu0 %v568_v7 }
  0x56   : > { %301 = vmatpush.bf16.xpose.msra.mxu0 %v567_v8 }
  0x5d   : > { %302 = vmatmul.bf16.vlgmr.msra.gmra.mxu0 %v566_v9 }
  0xda   : > { %v303_v11 = vpop.f32.mrf.mxu0 }
  0xdb   : > { %v308_v13 = vmul.f32 14.285714, %v303_v11  ;;  %v312_v14 = vmul.f32 %v303_v11, %v303_v11  ;;  %v324_v15 = vadd.f32 %v318_v10, %v303_v11 }
  0xdd   : > { %310 = vst [vmem:[%s725_s30] sm:$0xff] %v308_v13  ;;  %v314_v16 = vmul.f32 1.442695, %v308_v13  ;;  %v326_v17 = vadd.f32 %v320_v12, %v312_v14 }
  0xde   : > { %330 = vst [vmem:[#allocation2] sm:$0xff] %v324_v15 }
  0xdf   : > { %616 = vpow2.f32 %v314_v16  ;;  %332 = vst [vmem:[#allocation3 + $0x8] sm:$0xff] %v326_v17 }
  0xe2   : > { %v305_v19 = vpop.f32.mrf.mxu0 }
  0xe3   : > { %v309_v22 = vmul.f32 14.285714, %v305_v19  ;;  %v313_v23 = vmul.f32 %v305_v19, %v305_v19  ;;  %v325_v24 = vadd.f32 %v319_v18, %v305_v19 }
  0xe5   : > { %v617_v25 = vpop.eup %616  ;;  %311 = vst [vmem:[%s725_s30 + $0x8] sm:$0xff] %v309_v22  ;;  %v316_v26 = vmul.f32 1.442695, %v309_v22  ;;  %v327_v27 = vadd.f32 %v321_v20, %v313_v23 }
  0xe6   : > { %v328_v28 = vadd.f32 %v617_v25, %v322_v21  ;;  %331 = vst [vmem:[#allocation2 + $0x8] sm:$0xff] %v325_v24 }
  0xe7   : > { %618 = vpow2.f32 %v316_v26  ;;  %333 = vst [vmem:[#allocation3] sm:$0xff] %v327_v27 }
  0xe8   : > { %334 = vst [vmem:[#allocation4 + $0x8] sm:$0xff] %v328_v28 }
  0xec   : > { %339 = sbr.rel (%p560_p10) target bundleno = 373 (0x175), region = 36 }
  0xed   : > { %v619_v30 = vpop.eup %618 }
  0xee   : > { %v329_v31 = vadd.f32 %v619_v30, %v323_v29 }
  0xf0   : > { %335 = vst [vmem:[#allocation4] sm:$0xff] %v329_v31 }
  0xf1   : > { %344 = vadd.xlane.f32.xlu1 %v326_v17  ;;  %340 = vadd.xlane.f32.xlu0 %v324_v15  ;;  %vm352_vm0 = vcmask 7168   ;;  %vm355_vm1 = vcmask 15360   ;;  %vm358_vm2 = vcmask 23552   ;;  %vm361_vm3 = vcmask 31744  }
  0xf2   : > { %348 = vadd.xlane.f32.xlu2 %v328_v28  ;;  %vm364_vm4 = vcmask 39936   ;;  %vm367_vm5 = vcmask 48128   ;;  %vm370_vm6 = vcmask 56320   ;;  %vm373_vm7 = vcmask 64512  }
  0xf9   : > { %346 = vadd.xlane.f32.xlu1 %v327_v27  ;;  %342 = vadd.xlane.f32.xlu0 %v325_v24 }
  0xfa   : > { %350 = vadd.xlane.f32.xlu2 %v329_v31 }
 0x164   : > { %v345_v32 = vpop.xlane.xlu1 %344  ;;  %v341_v33 = vpop.xlane.xlu0 %340 }
 0x165   : > { %v353_v34 = vsel %vm352_vm0, %v341_v33, %v345_v32  ;;  %v349_v35 = vpop.xlane.xlu2 %348 }
 0x166   : > { %v356_v36 = vsel %vm355_vm1, %v353_v34, %v349_v35 }
 0x167   : > { %v359_v37 = vsel %vm358_vm2, %v356_v36, 0.0 }
 0x168   : > { %v362_v38 = vsel %vm361_vm3, %v359_v37, 0.0 }
 0x169   : > { %v365_v39 = vsel %vm364_vm4, %v362_v38, 0.0 }
 0x16a   : > { %v368_v40 = vsel %vm367_vm5, %v365_v39, 0.0 }
 0x16b   : > { %v371_v41 = vsel %vm370_vm6, %v368_v40, 0.0 }
 0x16c   : > { %374 = vst.msk [vmem:[%s778_s3] sm:$0xff] %vm373_vm7, %v371_v41  ;;  %v347_v42 = vpop.xlane.xlu1 %346  ;;  %v343_v43 = vpop.xlane.xlu0 %342 }
 0x16d   : > { %v354_v44 = vsel %vm352_vm0, %v343_v43, %v347_v42  ;;  %v351_v45 = vpop.xlane.xlu2 %350 }
 0x16e   : > { %v357_v46 = vsel %vm355_vm1, %v354_v44, %v351_v45 }
 0x16f   : > { %v360_v47 = vsel %vm358_vm2, %v357_v46, 0.0 }
 0x170   : > { %v363_v48 = vsel %vm361_vm3, %v360_v47, 0.0 }
 0x171   : > { %v366_v49 = vsel %vm364_vm4, %v363_v48, 0.0 }
 0x172   : > { %v369_v50 = vsel %vm367_vm5, %v366_v49, 0.0 }
 0x173   : > { %v372_v51 = vsel %vm370_vm6, %v369_v50, 0.0 }
 0x174   : > { %375 = vst.msk [vmem:[%s778_s3 + $0x8] sm:$0xff] %vm373_vm7, %v372_v51 }
 0x175 PF: > { %387 = sbr.rel (!%p710_p3) target bundleno = 378 (0x17a), region = 40  ;;  %s562_s10 = sshll.u32 (%p710_p3), %s650_s14, 3  ;;  %v422_v52 = vld [vmem:[%s725_s30] sm:$0xff] (%p710_p3)  ;;  %v424_v53 = vld [vmem:[%s725_s30 + $0x8] sm:$0xff] (%p710_p3) }
 0x176   : > { %s391_s17 = scalar_lea.vmem (%p710_p3), %s777_s2, %s562_s10 }
 0x177   : > { %423 = vst [vmem:[%s391_s17] sm:$0xff] (%p710_p3), %v422_v52 }
 0x178   : > { %425 = vst [vmem:[%s391_s17 + $0x20] sm:$0xff] (%p710_p3), %v424_v53 }
 0x17a PF: > { %s14_s16 = sadd.s32 1, %s658_s16   ;;  %s780_s12 = smov %s646_s13 }
 0x17b   : > { %p11_p11 = scmp.ge.s32.totalorder %s14_s16, 6   ;;  %s781_s13 = smov %s719_s22 }
 0x17c   : > { %s782_s14 = smov %s654_s15  ;;  %s783_s15 = smov %s785_s18 }
 0x17d   :  { %13 = sbr.rel (!%p11_p11) target bundleno = 3 (0x3), region = 116 }

// kernel: cmc_moco_forward.3
= control target key start
LH: loop header
LB: loop body
LE: loop exit
PB: predicated region body
PF: predicated region fallthrough
CT: control target
= control target key end

     0   :  { %9 = vsyncpa [#allocation6], 0  ;;  %s895_s0 = inlined_call_operand.vmem [shape: bf16[16,128], index: 0, kind: input, shape index: {}]   ;;  %s896_s1 = inlined_call_operand.hbm [shape: bf16[512,128], index: 1, kind: input, shape index: {}]   ;;  %s897_s2 = inlined_call_operand.vmem [shape: f32[16,512], index: 2, kind: output, shape index: {0}]   ;;  %s898_s3 = inlined_call_operand.vmem [shape: f32[1,16,8], index: 3, kind: output, shape index: {1}]  }
   0x1   :  { %11 = vsyncpa [#allocation6 + $0x1], 0  ;;  %s773_s12 = smov 0   ;;  %s775_s13 = smov 0  }
   0x2   :  { %s777_s14 = smov 0   ;;  %s779_s15 = smov 0  }
   0x3   :  { %s781_s16 = smov 0   ;;  %s783_s17 = smov 0  }
   0x4 LB: > { %s543_s18 = sadd.s32 4294967295, %s748_s17   ;;  %s26_s19 = sadd.s32 1, %s744_s16  ;;  %s748_s17 = sphi %s783_s17, %s17_s17   ;;  %s744_s16 = sphi %s781_s16, %s906_s16   ;;  %s740_s15 = sphi %s779_s15, %s905_s15   ;;  %s736_s14 = sphi %s777_s14, %s904_s14   ;;  %s732_s13 = sphi %s775_s13, %s903_s13   ;;  %s728_s12 = sphi %s773_s12, %s902_s12  }
   0x5   : > { %p27_p0 = scmp.ge.s32.totalorder %s26_s19, 4  ;;  %s61_s20 = sadd.s32 1, %s736_s14 }
   0x6   : > { %p68_p1 = scmp.ne.s32.totalorder %s736_s14, %s732_s13  ;;  %p69_p2 = scmp.eq.s32.totalorder %s748_s17, 0 }
   0x7   : > { %s908_s19 = smov (%p27_p0, %s26_s19), 0  ;;  %p74_p4 = scmp.ne.s32.totalorder %s732_s13, %s728_s12 }
   0x8   : > { %p809_p3 = por %p69_p2, %p68_p1  ;;  %s58_s22 = ssub.s32 %s744_s16, %s908_s19 }
   0x9   : > { %p75_p5 = scmp.eq.s32.totalorder %s543_s18, 0  ;;  %p59_p6 = scmp.eq.s32.totalorder %s58_s22, 0 }
   0xa   : > { %p102_p7 = scmp.eq.s32.totalorder %s543_s18, 3  ;;  %p612_p10 = scmp.lt.s32.totalorder %s748_s17, 4 }
   0xb   : > { %p816_p8 = por %p75_p5, %p74_p4  ;;  %s157_s26 = sand.u32 1, %s736_s14  }
   0xc   : > { %s821_s24 = scalar_select %p59_p6, %s736_s14, %s61_s20  }
   0xd   : > { %p823_p9 = por %p102_p7, %p68_p1  ;;  %s596_s27 = sshll.u32 %s744_s16, 6 }
   0xe   : > { %s547_s28 = sshll.u32 %s157_s26, 6  ;;  %s168_s4 = scalar_lea.hbm %s896_s1, %s596_s27 }
   0xf   : > { %s169_s5 = sshll.u32 %s168_s4, 4  ;;  %s161_s6 = scalar_lea.vmem [#allocation5], %s547_s28  ;;  %s170_s5 = int_to_ptr.hbm [resolvable:$true] %s169_s5 }
  0x10   : > { %s171_s7 = sshll.u32 %s161_s6, 4  ;;  %p609_p11 = pnand %p612_p10, %p809_p3  ;;  %s172_s7 = int_to_ptr.vmem [resolvable:$true] %s171_s7 }
  0x11   : > { %p550_p12 = scmp.ge.s32.totalorder %s748_s17, 1  ;;  %p179_p13 = scmp.lt.s32.totalorder %s748_s17, 5 }
  0x12   : > { %s158_s8 = scalar_lea.sflag [#allocation6], %s157_s26  ;;  %s750_s9 = smov 64  }
  0x13   : > { %s751_s10 = smov 4   ;;  %p180_p0 = pnand %p550_p12, %p179_p13 }
  0x14   : > { %611 = dma.hbm_to_vmem [thread:$0]  (!%p609_p11), %s170_s5, 1024, %s172_s7, %s158_s8, %s750_s9, %s750_s9, %s751_s10  }
  0x15   : > { %183 = sbr.rel (%p180_p0) target bundleno = 390 (0x186), region = 28  ;;  %s185_s11 = sand.u32 (!%p180_p0), 1, %s732_s13  }
  0x16   : > { %s551_s12 = sshll.u32 (!%p180_p0), %s185_s11, 6  ;;  %s186_s18 = scalar_lea.sflag (!%p180_p0), [#allocation6], %s185_s11 }
  0x17   : > { %s189_s20 = scalar_lea.vmem (!%p180_p0), [#allocation5], %s551_s12 }
  0x1a   : > { %723 = dma.done.wait (%p816_p8), %s186_s18, 1024  }
  0x1b   : > { %725 = vsyncadd (%p816_p8), %s186_s18, 4294966272  ;;  %s552_s21 = sshll.u32 %s185_s11, 4  ;;  %p553_p1 = scmp.ne.s32.totalorder %s740_s15, 0 }
  0x1c   : > { %s842_s22 = scalar_lea.vmem [#allocation7], %s552_s21 }
  0x1d   : > { %230 = sbr.rel (%p553_p1) target bundleno = 41 (0x29), region = 36 }
  0x22   : > { %v752_v0 = vmov 0.0  }
  0x23   : > { %231 = vst [vmem:[#allocation2] sm:$0xff] %v752_v0 }
  0x24   : > { %232 = vst [vmem:[#allocation2 + $0x8] sm:$0xff] %v752_v0 }
  0x25   : > { %233 = vst [vmem:[#allocation3 + $0x8] sm:$0xff] %v752_v0 }
  0x26   : > { %234 = vst [vmem:[#allocation3] sm:$0xff] %v752_v0 }
  0x27   : > { %235 = vst [vmem:[#allocation4 + $0x8] sm:$0xff] %v752_v0 }
  0x28   : > { %236 = vst [vmem:[#allocation4] sm:$0xff] %v752_v0 }
  0x29 PF: > { %v605_v1 = vld [vmem:[%s189_s20 + $0x38] sm:$0xff]  ;;  %v604_v2 = vld [vmem:[%s189_s20 + $0x30] sm:$0xff]  ;;  %v603_v3 = vld [vmem:[%s189_s20 + $0x28] sm:$0xff]  ;;  %p590_p2 = scmp.ne.s32.totalorder %s740_s15, 3 }
  0x2a   : > { %309 = vmatpush.bf16.xpose.msra.mxu0 %v605_v1  ;;  %v602_v4 = vld [vmem:[%s189_s20 + $0x20] sm:$0xff]  ;;  %v601_v5 = vld [vmem:[%s189_s20 + $0x18] sm:$0xff]  ;;  %v600_v6 = vld [vmem:[%s189_s20 + $0x10] sm:$0xff] }
  0x2b   : > { %v599_v7 = vld [vmem:[%s189_s20 + $0x8] sm:$0xff]  ;;  %v598_v8 = vld [vmem:[%s189_s20] sm:$0xff]  ;;  %v597_v9 = vld [vmem:[%s895_s0] sm:$0xff] }
  0x2c   : > { %v333_v10 = vld [vmem:[#allocation2] sm:$0xff]  ;;  %v335_v12 = vld [vmem:[#allocation3 + $0x8] sm:$0xff]  ;;  %v334_v18 = vld [vmem:[#allocation2 + $0x8] sm:$0xff] }
  0x2d   : > { %v336_v20 = vld [vmem:[#allocation3] sm:$0xff] }
  0x2e   : > { %v337_v21 = vld [vmem:[#allocation4 + $0x8] sm:$0xff] }
  0x2f   : > { %v338_v29 = vld [vmem:[#allocation4] sm:$0xff] }
  0x32   : > { %310 = vmatpush.bf16.xpose.msra.mxu0 %v604_v2 }
  0x3a   : > { %311 = vmatpush.bf16.xpose.msra.mxu0 %v603_v3 }
  0x42   : > { %312 = vmatpush.bf16.xpose.msra.mxu0 %v602_v4 }
  0x4a   : > { %313 = vmatpush.bf16.xpose.msra.mxu0 %v601_v5 }
  0x52   : > { %314 = vmatpush.bf16.xpose.msra.mxu0 %v600_v6 }
  0x5a   : > { %315 = vmatpush.bf16.xpose.msra.mxu0 %v599_v7 }
  0x62   : > { %316 = vmatpush.bf16.xpose.msra.mxu0 %v598_v8 }
  0x69   : > { %317 = vmatmul.bf16.vlgmr.msra.gmra.mxu0 %v597_v9 }
  0xe6   : > { %v318_v11 = vpop.f32.mrf.mxu0 }
  0xe7   : > { %v323_v13 = vmul.f32 14.285714, %v318_v11  ;;  %v327_v14 = vmul.f32 %v318_v11, %v318_v11  ;;  %v339_v15 = vadd.f32 %v333_v10, %v318_v11 }
  0xe9   : > { %325 = vst [vmem:[%s842_s22] sm:$0xff] %v323_v13  ;;  %v329_v16 = vmul.f32 1.442695, %v323_v13  ;;  %v341_v17 = vadd.f32 %v335_v12, %v327_v14 }
  0xea   : > { %345 = vst [vmem:[#allocation2] sm:$0xff] %v339_v15 }
  0xeb   : > { %664 = vpow2.f32 %v329_v16  ;;  %347 = vst [vmem:[#allocation3 + $0x8] sm:$0xff] %v341_v17 }
  0xee   : > { %v320_v19 = vpop.f32.mrf.mxu0 }
  0xef   : > { %v324_v22 = vmul.f32 14.285714, %v320_v19  ;;  %v328_v23 = vmul.f32 %v320_v19, %v320_v19  ;;  %v340_v24 = vadd.f32 %v334_v18, %v320_v19 }
  0xf1   : > { %v665_v25 = vpop.eup %664  ;;  %326 = vst [vmem:[%s842_s22 + $0x8] sm:$0xff] %v324_v22  ;;  %v331_v26 = vmul.f32 1.442695, %v324_v22  ;;  %v342_v27 = vadd.f32 %v336_v20, %v328_v23 }
  0xf2   : > { %v343_v28 = vadd.f32 %v665_v25, %v337_v21  ;;  %346 = vst [vmem:[#allocation2 + $0x8] sm:$0xff] %v340_v24 }
  0xf3   : > { %666 = vpow2.f32 %v331_v26  ;;  %348 = vst [vmem:[#allocation3] sm:$0xff] %v342_v27 }
  0xf4   : > { %349 = vst [vmem:[#allocation4 + $0x8] sm:$0xff] %v343_v28 }
  0xf8   : > { %354 = sbr.rel (%p590_p2) target bundleno = 385 (0x181), region = 40 }
  0xf9   : > { %v667_v30 = vpop.eup %666 }
  0xfa   : > { %v344_v31 = vadd.f32 %v667_v30, %v338_v29 }
  0xfc   : > { %350 = vst [vmem:[#allocation4] sm:$0xff] %v344_v31 }
  0xfd   : > { %359 = vadd.xlane.f32.xlu1 %v341_v17  ;;  %355 = vadd.xlane.f32.xlu0 %v339_v15  ;;  %vm367_vm0 = vcmask 7168   ;;  %vm370_vm1 = vcmask 15360   ;;  %vm373_vm2 = vcmask 23552   ;;  %vm376_vm3 = vcmask 31744  }
  0xfe   : > { %363 = vadd.xlane.f32.xlu2 %v343_v28  ;;  %vm379_vm4 = vcmask 39936   ;;  %vm382_vm5 = vcmask 48128   ;;  %vm385_vm6 = vcmask 56320   ;;  %vm388_vm7 = vcmask 64512  }
 0x105   : > { %361 = vadd.xlane.f32.xlu1 %v342_v27  ;;  %357 = vadd.xlane.f32.xlu0 %v340_v24 }
 0x106   : > { %365 = vadd.xlane.f32.xlu2 %v344_v31 }
 0x170   : > { %v360_v32 = vpop.xlane.xlu1 %359  ;;  %v356_v33 = vpop.xlane.xlu0 %355 }
 0x171   : > { %v368_v34 = vsel %vm367_vm0, %v356_v33, %v360_v32  ;;  %v364_v35 = vpop.xlane.xlu2 %363 }
 0x172   : > { %v371_v36 = vsel %vm370_vm1, %v368_v34, %v364_v35 }
 0x173   : > { %v374_v37 = vsel %vm373_vm2, %v371_v36, 0.0 }
 0x174   : > { %v377_v38 = vsel %vm376_vm3, %v374_v37, 0.0 }
 0x175   : > { %v380_v39 = vsel %vm379_vm4, %v377_v38, 0.0 }
 0x176   : > { %v383_v40 = vsel %vm382_vm5, %v380_v39, 0.0 }
 0x177   : > { %v386_v41 = vsel %vm385_vm6, %v383_v40, 0.0 }
 0x178   : > { %389 = vst.msk [vmem:[%s898_s3] sm:$0xff] %vm388_vm7, %v386_v41  ;;  %v362_v42 = vpop.xlane.xlu1 %361  ;;  %v358_v43 = vpop.xlane.xlu0 %357 }
 0x179   : > { %v369_v44 = vsel %vm367_vm0, %v358_v43, %v362_v42  ;;  %v366_v45 = vpop.xlane.xlu2 %365 }
 0x17a   : > { %v372_v46 = vsel %vm370_vm1, %v369_v44, %v366_v45 }
 0x17b   : > { %v375_v47 = vsel %vm373_vm2, %v372_v46, 0.0 }
 0x17c   : > { %v378_v48 = vsel %vm376_vm3, %v375_v47, 0.0 }
 0x17d   : > { %v381_v49 = vsel %vm379_vm4, %v378_v48, 0.0 }
 0x17e   : > { %v384_v50 = vsel %vm382_vm5, %v381_v49, 0.0 }
 0x17f   : > { %v387_v51 = vsel %vm385_vm6, %v384_v50, 0.0 }
 0x180   : > { %390 = vst.msk [vmem:[%s898_s3 + $0x8] sm:$0xff] %vm388_vm7, %v387_v51 }
 0x181 PF: > { %402 = sbr.rel (!%p823_p9) target bundleno = 390 (0x186), region = 44  ;;  %s592_s4 = sshll.u32 (%p823_p9), %s740_s15, 3  ;;  %v437_v52 = vld [vmem:[%s842_s22] sm:$0xff] (%p823_p9)  ;;  %v439_v53 = vld [vmem:[%s842_s22 + $0x8] sm:$0xff] (%p823_p9) }
 0x182   : > { %s406_s7 = scalar_lea.vmem (%p823_p9), %s897_s2, %s592_s4 }
 0x183   : > { %438 = vst [vmem:[%s406_s7] sm:$0xff] (%p823_p9), %v437_v52 }
 0x184   : > { %440 = vst [vmem:[%s406_s7 + $0x20] sm:$0xff] (%p823_p9), %v439_v53 }
 0x186 PF: > { %s17_s17 = sadd.s32 1, %s748_s17   ;;  %s902_s12 = smov %s732_s13 }
 0x187   : > { %p14_p3 = scmp.ge.s32.totalorder %s17_s17, 6   ;;  %s903_s13 = smov %s736_s14 }
 0x188   : > { %s904_s14 = smov %s821_s24  ;;  %s905_s15 = smov %s744_s16 }
 0x189   : > { %s906_s16 = smov %s908_s19  ;;  %16 = sbr.rel (!%p14_p3) target bundleno = 4 (0x4), region = 126 }
 0x18e   :  { %467 = vsyncpa [#allocation6], 1 }
 0x18f   :  { %469 = vsyncpa [#allocation6 + $0x1], 1 }

</bundles_post_ra>
